<compile_context>
chip_gen: v7x
topology: tpu7x:2x2x1
jax: 0.10.0
libtpu: 0.0.40
codegen_flags: <defaults>
</compile_context>

<pallas_src>
import math

import jax
import jax.numpy as jnp
from jax.experimental import pallas as pl
from jax.experimental.pallas import tpu as pltpu


_LANE = 128
_VMEM_LIMIT_BYTES = 48 * 1024 * 1024    # safe ceiling on v5e / v6e / v7x (64 MiB/TC)
_TILE_BUDGET_BYTES = 36 * 1024 * 1024   # double-buffered tile working-set target


def _round_up(x, m):
    return ((x + m - 1) // m) * m


# ---------------------------------------------------------------------------
# Kernels
# ---------------------------------------------------------------------------
def _linear_relu_kernel(x_ref, w_ref, b_ref, o_ref):
    """Single-K-step fused linear + bias + ReLU (no scratch, no k axis)."""
    # In-kernel activation cast: avoids a separate per-call HBM cast pass on x.
    x = x_ref[...].astype(w_ref.dtype)
    acc = jnp.dot(x, w_ref[...], preferred_element_type=jnp.float32)
    o_ref[...] = jnp.maximum(acc + b_ref[...], 0.0).astype(o_ref.dtype)


def _linear_relu_kernel_kacc(x_ref, w_ref, b_ref, o_ref, acc_ref):
    """Huge-K fallback: K-tiled reduction with a bias-seeded f32 accumulator."""
    k = pl.program_id(2)

    @pl.when(k == 0)
    def _():
        # Seed the accumulator with the broadcast bias -> no epilogue add.
        acc_ref[...] = jnp.broadcast_to(b_ref[...], acc_ref.shape)

    x = x_ref[...].astype(w_ref.dtype)
    acc_ref[...] += jnp.dot(x, w_ref[...], preferred_element_type=jnp.float32)

    @pl.when(k == pl.num_programs(2) - 1)
    def _():
        o_ref[...] = jnp.maximum(acc_ref[...], 0.0).astype(o_ref.dtype)


# ---------------------------------------------------------------------------
# Tile selection
# ---------------------------------------------------------------------------
def _tile_bytes(tm, tk, tn, x_item, w_item, o_item):
    # All operands are double-buffered by the Pallas pipeline.
    return 2 * (tm * tk * x_item + tk * tn * w_item + tm * tn * o_item)


def _choose_tiles(M, K, Np, x_item, w_item, o_item):
    """Pick (tm, tn, tk); prefer tk == K (single reduction step)."""
    tm = min(_round_up(M, 16), 512)        # 16-row multiples: full bf16 sublane packing
    tn = min(Np, 1024)                     # lane-dense, large-N tiles (Np is 128-aligned)

    # Shrink tn, then tm, until the double-buffered working set fits the budget.
    while _tile_bytes(tm, K, tn, x_item, w_item, o_item) > _TILE_BUDGET_BYTES:
        if tn > _LANE:
            tn = max(_LANE, (tn // 2) // _LANE * _LANE)
        elif tm > 16:
            tm = max(16, tm // 2)
        else:
            break

    if _tile_bytes(tm, K, tn, x_item, w_item, o_item) <= _TILE_BUDGET_BYTES:
        tk = K                             # fast path: single K step
    else:
        tk = 2048                          # enormous-K fallback: split the reduction
        while (tk > 512 and
               _tile_bytes(tm, tk, tn, x_item, w_item, o_item) > _TILE_BUDGET_BYTES):
            tk //= 2

    # v7x megacore: keep >= 2 steps on a parallel grid axis when the output allows,
    # so both TensorCores get work (a harmless extra grid step on v5e/v6e).
    if pl.cdiv(M, tm) * pl.cdiv(Np, tn) < 2:
        if Np >= 2 * _LANE:
            tn = _round_up(Np // 2, _LANE)
        elif M >= 32:
            tm = _round_up((M + 1) // 2, 16)
    return tm, tn, tk


# ---------------------------------------------------------------------------
# Parameter packing (done once — no per-call weight HBM passes)
# ---------------------------------------------------------------------------
def pack_params(weight_t, bias, *, compute_dtype=jnp.bfloat16):
    """Pack an (in_features, out_features) weight and (out_features,) bias.

    The weight is cast to `compute_dtype` and padded along N to a lane multiple
    here, once, so relu_linear never re-reads/re-writes it per call.
    Use compute_dtype=jnp.float32 for strict f32 parity with PyTorch nn.Linear.
    """
    K, N = weight_t.shape
    Np = _round_up(N, _LANE)
    w = weight_t if compute_dtype is None else weight_t.astype(compute_dtype)
    if Np != N:
        w = jnp.pad(w, ((0, 0), (0, Np - N)))
    b = jnp.pad(bias.astype(jnp.float32), (0, Np - N)).reshape(1, Np)
    return {"weight_t": w, "bias": b, "out_features": N}


def init_params(key, in_features, out_features, *, compute_dtype=jnp.bfloat16):
    """torch: kaiming_normal_(nonlinearity='relu') -> std = sqrt(2/fan_in); bias = 0."""
    std = math.sqrt(2.0 / in_features)
    weight_t = std * jax.random.normal(key, (in_features, out_features), jnp.float32)
    bias = jnp.zeros((out_features,), jnp.float32)
    return pack_params(weight_t, bias, compute_dtype=compute_dtype)


# ---------------------------------------------------------------------------
# Forward
# ---------------------------------------------------------------------------
def relu_linear(x, weight_t, bias2d, out_features, *, tm=None, tn=None, tk=None):
    """relu(x @ weight_t + bias) with weight_t: (K, Np) pre-packed, bias2d: (1, Np)."""
    orig_shape = x.shape
    K = orig_shape[-1]
    x2 = x.reshape(-1, K)
    M = x2.shape[0]
    Kw, Np = weight_t.shape
    assert Kw == K and bias2d.shape == (1, Np) and Np % _LANE == 0
    out_dtype = x.dtype

    x_item = x2.dtype.itemsize
    w_item = weight_t.dtype.itemsize
    o_item = jnp.dtype(out_dtype).itemsize

    a_tm, a_tn, a_tk = _choose_tiles(M, K, Np, x_item, w_item, o_item)
    tm = a_tm if tm is None else tm
    tn = a_tn if tn is None else tn
    tk = a_tk if tk is None else tk
    assert tm % 8 == 0 and tn % _LANE == 0

    num_m = pl.cdiv(M, tm)
    num_n = pl.cdiv(Np, tn)

    cost = pl.CostEstimate(
        flops=2 * M * K * Np,
        transcendentals=0,
        bytes_accessed=(x2.size * x_item + weight_t.size * w_item
                        + bias2d.size * 4 + M * Np * o_item),
    )

    if tk >= K:
        # ---- fast path: whole reduction in one step; no scratch, no k axis ----
        # Pick the grid order so the operand with the larger re-stream cost stays
        # resident (Pallas skips DMAs when a block index repeats between steps).
        x_bytes = M * K * x_item
        w_bytes = K * Np * w_item
        if w_bytes + num_n * x_bytes <= x_bytes + num_m * w_bytes:
            grid = (num_n, num_m)                       # m innermost: W streamed once
            x_map = lambda j, i: (i, 0)
            w_map = lambda j, i: (0, j)
            b_map = lambda j, i: (0, j)
            o_map = lambda j, i: (i, j)
        else:
            grid = (num_m, num_n)                       # n innermost: x streamed once
            x_map = lambda i, j: (i, 0)
            w_map = lambda i, j: (0, j)
            b_map = lambda i, j: (0, j)
            o_map = lambda i, j: (i, j)

        out = pl.pallas_call(
            _linear_relu_kernel,
            out_shape=jax.ShapeDtypeStruct((M, Np), out_dtype),
            grid_spec=pltpu.PrefetchScalarGridSpec(
                num_scalar_prefetch=0,
                grid=grid,
                in_specs=[
                    pl.BlockSpec((tm, K), x_map),       # x tile (full K)
                    pl.BlockSpec((K, tn), w_map),       # weight tile (K, tn)
                    pl.BlockSpec((1, tn), b_map),       # bias tile
                ],
                out_specs=pl.BlockSpec((tm, tn), o_map),
            ),
            compiler_params=pltpu.CompilerParams(
                dimension_semantics=("parallel", "parallel"),
                vmem_limit_bytes=_VMEM_LIMIT_BYTES,
            ),
            cost_estimate=cost,
        )(x2, weight_t, bias2d)
    else:
        # ---- rare enormous-K fallback: K-tiled accumulation ----
        # The K remainder is zero-padded per call here (zeros add nothing); for a
        # steady-state huge-K workload, pre-pad K at init or pick tk | K.
        assert tk % _LANE == 0
        Kp = _round_up(K, tk)
        if Kp != K:
            x2 = jnp.pad(x2, ((0, 0), (0, Kp - K)))
            weight_t = jnp.pad(weight_t, ((0, Kp - K), (0, 0)))
        num_k = Kp // tk
        out = pl.pallas_call(
            _linear_relu_kernel_kacc,
            out_shape=jax.ShapeDtypeStruct((M, Np), out_dtype),
            grid_spec=pltpu.PrefetchScalarGridSpec(
                num_scalar_prefetch=0,
                grid=(num_n, num_m, num_k),
                in_specs=[
                    pl.BlockSpec((tm, tk), lambda j, i, k: (i, k)),
                    pl.BlockSpec((tk, tn), lambda j, i, k: (k, j)),
                    pl.BlockSpec((1, tn), lambda j, i, k: (0, j)),
                ],
                out_specs=pl.BlockSpec((tm, tn), lambda j, i, k: (i, j)),
                scratch_shapes=[pltpu.VMEM((tm, tn), jnp.float32)],
            ),
            compiler_params=pltpu.CompilerParams(
                dimension_semantics=("parallel", "parallel", "arbitrary"),
                vmem_limit_bytes=_VMEM_LIMIT_BYTES,
            ),
            cost_estimate=cost,
        )(x2, weight_t, bias2d)

    if Np != out_features:
        out = out[:, :out_features]
    return out.reshape(*orig_shape[:-1], out_features)


def relu_activation_layer(params, x, *, tm=None, tn=None, tk=None):
    """Forward of the PyTorch ReLUActivationLayer: relu(linear(x))."""
    return relu_linear(x, params["weight_t"], params["bias"], params["out_features"],
                       tm=tm, tn=tn, tk=tk)


# ---------------------------------------------------------------------------
if __name__ == "__main__":
    key = jax.random.PRNGKey(0)
    k_w, k_w2, k_b, k_x = jax.random.split(key, 4)

    in_features, out_features, batch = 288, 320, 8

    # Module-equivalent params (kaiming-normal relu weight, zero bias), bf16 MXU weights.
    params = init_params(k_w, in_features, out_features)
    x = jax.random.normal(k_x, (batch, in_features), jnp.float32)

    w_full = params["weight_t"][:, :out_features]          # (K, N) bf16
    b_full = params["bias"][0, :out_features]              # (N,)  f32

    # Matching-precision reference (bf16 MXU inputs, f32 accumulation / epilogue).
    y_ref = jnp.maximum(
        jnp.dot(x.astype(w_full.dtype), w_full, preferred_element_type=jnp.float32)
        + b_full, 0.0)

    # 1) default fast path: single K step, auto tiles, megacore-split N.
    y1 = jax.block_until_ready(relu_activation_layer(params, x))
    # 2) forced small-tile K-accumulator fallback path (3 K steps).
    y2 = jax.block_until_ready(relu_activation_layer(params, x, tm=16, tn=128, tk=128))

    assert y1.shape == (batch, out_features)
    assert y2.shape == (batch, out_features)
    assert jnp.allclose(y1, y_ref, atol=1e-3, rtol=1e-3)
    assert jnp.allclose(y2, y_ref, atol=1e-3, rtol=1e-3)

    # 3) strict-parity option: f32 weights + non-zero bias packed once via pack_params.
    w_raw = math.sqrt(2.0 / in_features) * jax.random.normal(
        k_w2, (in_features, out_features), jnp.float32)
    b_raw = 0.1 * jax.random.normal(k_b, (out_features,), jnp.float32)
    params32 = pack_params(w_raw, b_raw, compute_dtype=jnp.float32)
    y3 = jax.block_until_ready(relu_activation_layer(params32, x))
    y3_ref = jnp.maximum(
        jnp.dot(x, w_raw, precision=jax.lax.Precision.HIGHEST) + b_raw, 0.0)
    assert y3.shape == (batch, out_features)
    assert jnp.allclose(y3, y3_ref, atol=1e-2, rtol=1e-2)

    print("KERNEL_OK")
</pallas_src>

<mosaic_0001>
module attributes {stable_mosaic.version = 11 : i64} {
  func.func @_linear_relu_kernel(%arg0: i32, %arg1: i32, %arg2: memref<16x288xf32, #tpu.memory_space<vmem>>, %arg3: memref<288x256xbf16, #tpu.memory_space<vmem>>, %arg4: memref<1x256xf32, #tpu.memory_space<vmem>>, %arg5: memref<16x256xf32, #tpu.memory_space<vmem>>) attributes {dimension_semantics = [#tpu.dimension_semantics<parallel>, #tpu.dimension_semantics<parallel>], iteration_bounds = array<i64: 1, 2>, scalar_prefetch = 0 : i64, scratch_operands = 0 : i64, tpu.core_type = #tpu.core_type<tc>, window_params = [{transform_indices = @transform_0, window_bounds = array<i64: 16, 288>}, {transform_indices = @transform_1, window_bounds = array<i64: 288, 256>}, {transform_indices = @transform_2, window_bounds = array<i64: 1, 256>}, {transform_indices = @transform_3, window_bounds = array<i64: 16, 256>}]} {
    %c0 = arith.constant 0 : index
    %c0_0 = arith.constant 0 : index
    %0 = vector.load %arg2[%c0, %c0_0] : memref<16x288xf32, #tpu.memory_space<vmem>>, vector<16x288xf32>
    %1 = arith.truncf %0 : vector<16x288xf32> to vector<16x288xbf16>
    %c0_1 = arith.constant 0 : index
    %c0_2 = arith.constant 0 : index
    %2 = vector.load %arg3[%c0_1, %c0_2] : memref<288x256xbf16, #tpu.memory_space<vmem>>, vector<288x256xbf16>
    %cst = arith.constant dense<0.000000e+00> : vector<16x256xf32>
    %3 = tpu.matmul %1, %2, %cst {dimension_numbers = #tpu.dot_dimension_numbers<[1], [0], [0], [1], [0, 0, 1, 1], [], []>} : vector<16x288xbf16>, vector<288x256xbf16>, vector<16x256xf32> -> vector<16x256xf32>
    %c0_3 = arith.constant 0 : index
    %c0_4 = arith.constant 0 : index
    %4 = vector.load %arg4[%c0_3, %c0_4] : memref<1x256xf32, #tpu.memory_space<vmem>>, vector<1x256xf32>
    %5 = vector.broadcast %4 : vector<1x256xf32> to vector<16x256xf32>
    %6 = arith.addf %3, %5 : vector<16x256xf32>
    %cst_5 = arith.constant 0.000000e+00 : f32
    %7 = vector.broadcast %cst_5 : f32 to vector<16x256xf32>
    %8 = arith.maximumf %6, %7 : vector<16x256xf32>
    %c0_6 = arith.constant 0 : index
    %c0_7 = arith.constant 0 : index
    %9 = vector.load %arg5[%c0_6, %c0_7] : memref<16x256xf32, #tpu.memory_space<vmem>>, vector<16x256xf32>
    tpu.vector_store %arg5[%c0_6, %c0_7], %8 {strides = array<i32>} : memref<16x256xf32, #tpu.memory_space<vmem>>, vector<16x256xf32>,
    return
  }
  func.func @transform_0(%arg0: i32, %arg1: i32) -> (i32, i32) {
    %c0_i32 = arith.constant 0 : i32
    %c0_i32_0 = arith.constant 0 : i32
    return %arg0, %c0_i32 : i32, i32
  }
  func.func @transform_1(%arg0: i32, %arg1: i32) -> (i32, i32) {
    %c0_i32 = arith.constant 0 : i32
    %c0_i32_0 = arith.constant 0 : i32
    return %c0_i32, %arg1 : i32, i32
  }
  func.func @transform_2(%arg0: i32, %arg1: i32) -> (i32, i32) {
    %c0_i32 = arith.constant 0 : i32
    %c0_i32_0 = arith.constant 0 : i32
    return %c0_i32, %arg1 : i32, i32
  }
  func.func @transform_3(%arg0: i32, %arg1: i32) -> (i32, i32) {
    %c0_i32 = arith.constant 0 : i32
    return %arg0, %arg1 : i32, i32
  }
}

</mosaic_0001>

<bundles_post_ra>
// kernel: tpu_custom_call.1
= control target key start
LH: loop header
LB: loop body
LE: loop exit
PB: predicated region body
PF: predicated region fallthrough
CT: control target
= control target key end

     0   :  { %8 = vsyncpa [#allocation3], 0  ;;  %s1402_s0 = inlined_call_operand.hbm [shape: f32[8,288], index: 0, kind: input, shape index: {}]   ;;  %s1403_s1 = inlined_call_operand.hbm [shape: bf16[288,384], index: 1, kind: input, shape index: {}]   ;;  %s1404_s2 = inlined_call_operand.vmem [shape: f32[1,384], index: 2, kind: input, shape index: {}]   ;;  %s1405_s3 = inlined_call_operand.hbm [shape: f32[8,384], index: 3, kind: output, shape index: {}]  }
   0x1   :  { %9 = vsyncpa [#allocation6], 0 }
   0x2   :  { %11 = vsyncpa [#allocation6 + $0x1], 0 }
   0x3   :  { %12 = vsyncpa [#allocation4], 0 }
   0x4   :  { %14 = vsyncpa [#allocation4 + $0x1], 0  ;;  %s1125_s12 = smov 0   ;;  %s1127_s13 = smov 0  }
   0x5   :  { %s1129_s14 = smov 0   ;;  %s1131_s15 = smov 0  }
   0x6   :  { %s1133_s16 = smov 0   ;;  %s1135_s17 = smov 0  }
   0x7 LB: > { %s1156_s18 = sadd.s32 4294967295, %s1093_s17   ;;  %s765_s19 = sadd.s32 4294967294, %s1093_s17   ;;  %s1093_s17 = sphi %s1135_s17, %s20_s17   ;;  %s1089_s16 = sphi %s1133_s16, %s1422_s16   ;;  %s1085_s15 = sphi %s1131_s15, %s1421_s15   ;;  %s1081_s14 = sphi %s1129_s14, %s1420_s14   ;;  %s1077_s13 = sphi %s1127_s13, %s1419_s13   ;;  %s1073_s12 = sphi %s1125_s12, %s1418_s12  }
   0x8   : > { %s29_s20 = sadd.s32 1, %s1089_s16  ;;  %s65_s21 = sadd.s32 1, %s1081_s14 }
   0x9   : > { %p30_p0 = scmp.ge.s32.totalorder %s29_s20, 2  ;;  %p72_p1 = scmp.ne.s32.totalorder %s1081_s14, %s1077_s13 }
   0xa   : > { %p73_p2 = scmp.eq.s32.totalorder %s1093_s17, 0  ;;  %p78_p3 = scmp.ne.s32.totalorder %s1077_s13, %s1073_s12 }
   0xb   : > { %s1424_s20 = smov (%p30_p0, %s29_s20), 0  ;;  %p1407_p5 = scmp.eq.s32.totalorder %s1156_s18, 0 }
   0xc   : > { %p1168_p4 = por %p73_p2, %p72_p1  ;;  %s62_s23 = ssub.s32 %s1089_s16, %s1424_s20 }
   0xd   : > { %p130_p6 = scmp.eq.s32.totalorder %s1156_s18, 1  ;;  %p63_p7 = scmp.eq.s32.totalorder %s62_s23, 0 }
   0xe   : > { %p1178_p8 = por %p1407_p5, %p78_p3  ;;  %p136_p10 = scmp.eq.s32.totalorder %s765_s19, 1 }
   0xf   : > { %p1182_p9 = por %p130_p6, %p72_p1  ;;  %p766_p12 = scmp.ge.s32.totalorder %s1093_s17, 1 }
  0x10   : > { %s1187_s26 = scalar_select %p63_p7, %s1081_s14, %s65_s21  }
  0x11   : > { %s1410_s25 = scalar_select %p1182_p9, 1, 0 }
  0x12   : > { %p1189_p11 = por %p136_p10, %p78_p3  ;;  %p143_p13 = scmp.lt.s32.totalorder %s1093_s17, 3 }
  0x14   : > { %s1411_s27 = scalar_select %p1189_p11, 1, 0 }
  0x15   : > { %p1195_p0 = pnand %p766_p12, %p143_p13 }
  0x16   : > { %p767_p1 = scmp.ne.s32.totalorder (!%p1195_p0), %s1156_s18, 0 }
  0x17   : > { %147 = sbr.rel (%p1195_p0) target bundleno = 55 (0x37), region = 12 }
  0x1e   : > { %151 = sbr.rel (%p767_p1) target bundleno = 55 (0x37), region = 16 }
  0x25   : > { %158 = vsyncadd [#allocation3], 384  ;;  %s1095_s29 = smov [#allocation2]   ;;  %s957_s6 = scalar_lea.hbm %s1402_s0, 384 }
  0x26   : > { %s164_s30 = sshll.u32 %s1095_s29, 4  ;;  %p958_p2 = scmp.ne.s32.totalorder %s1402_s0, %s957_s6  ;;  %s165_s30 = int_to_ptr.vmem [resolvable:$true] %s164_s30 }
  0x27   : > { %p961_p3 = scmp.lt.u32.totalorder %s957_s6, %s1402_s0 }
  0x29   : > { %p963_p6 = pnand %p961_p3, %p958_p2 }
  0x2b   : > { %966 = shalt.err (!%p963_p6)
}
  0x2c   : > { %s967_s11 = scalar_lea.vmem %s165_s30, 384  ;;  %s971_s19 = scalar_lea.vmem %s165_s30, 768 }
  0x2d   : > { %p968_p7 = scmp.ne.s32.totalorder %s165_s30, %s967_s11  ;;  %p972_p10 = scmp.lt.s32.totalorder %s165_s30, %s165_s30 }
  0x2e   : > { %p973_p12 = scmp.lt.s32.totalorder %s971_s19, %s967_s11 }
  0x30   : > { %p974_p13 = por %p973_p12, %p972_p10 }
  0x32   : > { %p975_p1 = pnand %p974_p13, %p968_p7 }
  0x34   : > { %978 = shalt.err (!%p975_p1)
}
  0x35   : > { %s1096_s21 = smov 384   ;;  %s1097_s23 = smov 24  }
  0x36   : > { %170 = dma.hbm_to_vmem [thread:$0]  %s1402_s0, 384, %s165_s30, [#allocation3], %s1096_s21, %s1096_s21, %s1097_s23  }
  0x37 PF: > { %p1406_p2 = scmp.ge.s32.totalorder %s1093_s17, 2 }
  0x39   : > { %174 = sbr.rel (%p1406_p2) target bundleno = 100 (0x64), region = 20 }
  0x40   : > { %177 = sbr.rel (!%p1168_p4) target bundleno = 100 (0x64), region = 24  ;;  %s178_s5 = sand.u32 (%p1168_p4), 1, %s1081_s14  }
  0x41   : > { %s769_s6 = sshll.u32 (%p1168_p4), %s1089_s16, 1  ;;  %s835_s7 = smul.u32 (%p1168_p4), 288, %s178_s5 }
  0x42   : > { %s184_s8 = ssub.s32 (%p1168_p4), 3, %s769_s6  ;;  %s1227_s10 = scalar_lea.sflag (%p1168_p4), [#allocation6], %s178_s5 }
  0x43   : > { %p185_p3 = scmp.lt.s32.totalorder (%p1168_p4), %s184_s8, 2  ;;  %s182_s11 = scalar_lea.vmem (%p1168_p4), [#allocation5], %s835_s7 }
  0x47   : > { %s1426_s8 = smov (!%p185_p3, %s184_s8), 2 }
  0x48   : > { %s1224_s30 = smul.u32 2304, %s1426_s8 }
  0x4a   : > { %s189_s9 = ssub.s32 4608, %s1224_s30 }
  0x4b   : > { %190 = vsyncadd %s1227_s10, %s189_s9  ;;  %p770_p4 = scmp.ne.s32.totalorder %s1224_s30, 0  ;;  %s825_s22 = sshll.u32 %s1089_s16, 7 }
  0x4c   : > { %s1235_s23 = scalar_lea.hbm %s1403_s1, %s825_s22  ;;  %s772_s29 = sshll.u32 %s1426_s8, 2 }
  0x4d   : > { %s196_s4 = sshll.u32 %s182_s11, 4  ;;  %s979_s5 = scalar_lea.hbm %s1235_s23, %s1224_s30  ;;  %s1238_s4 = int_to_ptr.vmem [resolvable:$true] %s196_s4 }
  0x4e   : > { %p980_p6 = scmp.ne.s32.totalorder %s1235_s23, %s979_s5  ;;  %s983_s9 = scalar_lea.hbm %s1403_s1, 6912 }
  0x4f   : > { %p984_p12 = scmp.lt.u32.totalorder %s1235_s23, %s1403_s1  ;;  %p985_p13 = scmp.lt.u32.totalorder %s983_s9, %s979_s5 }
  0x50   : > { %p981_p7 = pnand %p980_p6, %p770_p4  ;;  %p987_p3 = scmp.lt.u32.totalorder %s979_s5, %s1235_s23 }
  0x51   : > { %p986_p1 = por %p985_p13, %p984_p12 }
  0x52   : > { %p982_p10 = pneg %p981_p7 }
  0x53   : > { %p988_p2 = por %p987_p3, %p986_p1 }
  0x55   : > { %p989_p5 = pnand %p988_p2, %p982_p10 }
  0x57   : > { %992 = shalt.err (!%p989_p5)
}
  0x58   : > { %s993_s11 = scalar_lea.vmem %s1238_s4, %s1224_s30  ;;  %s1098_s21 = smov [#allocation5]  }
  0x59   : > { %p994_p6 = scmp.ne.s32.totalorder %s1238_s4, %s993_s11  ;;  %s997_s6 = sshll.u32 %s1098_s21, 4  ;;  %s998_s6 = int_to_ptr.vmem [resolvable:$false] %s997_s6 }
  0x5a   : > { %s999_s7 = scalar_lea.vmem %s998_s6, 9216  ;;  %p1000_p9 = scmp.lt.s32.totalorder %s1238_s4, %s998_s6 }
  0x5b   : > { %p995_p7 = pnand %p994_p6, %p770_p4  ;;  %p1001_p12 = scmp.lt.s32.totalorder %s999_s7, %s993_s11 }
  0x5d   : > { %p996_p11 = pneg %p995_p7  ;;  %p1002_p13 = por %p1001_p12, %p1000_p9 }
  0x5f   : > { %p1003_p1 = pnand %p1002_p13, %p996_p11 }
  0x61   : > { %1006 = shalt.err (!%p1003_p1)
}
  0x62   : > { %s1099_s5 = smov 192   ;;  %s1100_s9 = smov 128  }
  0x63   : > { %202 = dma.hbm_to_vmem [thread:$0]  (%p770_p4), %s1235_s23, %s1224_s30, %s1238_s4, %s1227_s10, %s1099_s5, %s1100_s9, %s772_s29  }
  0x64 PF: > { %224 = sbr.rel (%p1195_p0) target bundleno = 429 (0x1ad), region = 32  ;;  %p1413_p5 = scmp.eq.s32.totalorder (!%p1195_p0), %s1156_s18, 0 }
  0x6b   : > { %1060 = dma.done.wait (%p1413_p5), [#allocation3], 768   ;;  %p1414_p9 = pmov %p1413_p5 }
  0x6c   : > { %s1274_s19 = sand.u32 1, %s1077_s13  }
  0x6d   : > { %1062 = vsyncadd (%p1414_p9), [#allocation3], 4294966528  ;;  %s836_s22 = smul.u32 288, %s1274_s19  ;;  %s231_s8 = scalar_lea.sflag [#allocation6], %s1274_s19 }
  0x6f   : > { %s1278_s30 = scalar_lea.vmem [#allocation5], %s836_s22 }
  0x70   : > { %1064 = dma.done.wait (%p1178_p8), %s231_s8, 4608  }
  0x71   : > { %1066 = vsyncadd (%p1178_p8), %s231_s8, 4294962688  ;;  %v1101_v0 = vmov 0   ;;  %v903_v1 = vld [vmem:[%s1278_s30 + $0x4] ss:$8 sps:$4 sm:$0xff]   ;;  %v905_v2 = vld [vmem:[%s1278_s30] ss:$8 sps:$4 sm:$0xff]   ;;  %v343_v50 = vlaneseq }
  0x72   : > { %612 = vmatprep.mubr.bf16.mxu0 %v1101_v0  ;;  %537 = vmatprep.subr.bf16.mxu1 %v903_v1  ;;  %v906_v3 = vld [vmem:[%s1278_s30 + $0x14] ss:$8 sps:$4 sm:$0xff]   ;;  %v908_v4 = vld [vmem:[%s1278_s30 + $0x10] ss:$8 sps:$4 sm:$0xff]   ;;  %v909_v5 = vld [vmem:[%s1278_s30 + $0x24] ss:$8 sps:$4 sm:$0xff]  }
  0x73   : > { %538 = vmatpush1.bf16.msra.mxu1 %v905_v2  ;;  %v911_v6 = vld [vmem:[%s1278_s30 + $0x20] ss:$8 sps:$4 sm:$0xff]   ;;  %v912_v7 = vld [vmem:[%s1278_s30 + $0x34] ss:$8 sps:$4 sm:$0xff]   ;;  %v914_v8 = vld [vmem:[%s1278_s30 + $0x30] ss:$8 sps:$4 sm:$0xff]  }
  0x74   : > { %539 = vmatprep.subr.bf16.mxu1 %v906_v3  ;;  %v915_v9 = vld [vmem:[%s1278_s30 + $0x44] ss:$8 sps:$4 sm:$0xff]   ;;  %v917_v10 = vld [vmem:[%s1278_s30 + $0x40] ss:$8 sps:$4 sm:$0xff]   ;;  %v918_v11 = vld [vmem:[%s1278_s30 + $0x54] ss:$8 sps:$4 sm:$0xff]  }
  0x75   : > { %v920_v12 = vld [vmem:[%s1278_s30 + $0x50] ss:$8 sps:$4 sm:$0xff]   ;;  %v945_v13 = vld [vmem:[%s1278_s30 + $0x104] ss:$8 sps:$4 sm:$0xff]   ;;  %v949_v15 = vld [vmem:[%s1278_s30 + $0x100] ss:$8 sps:$4 sm:$0xff]  }
  0x76   : > { %v921_v14 = vld [vmem:[%s1278_s30 + $0x64] ss:$8 sps:$4 sm:$0xff]   ;;  %580 = vmatprep.subr.bf16.mxu0 %v945_v13  ;;  %v951_v16 = vld [vmem:[%s1278_s30 + $0x114] ss:$8 sps:$4 sm:$0xff]   ;;  %v923_v17 = vld [vmem:[%s1278_s30 + $0x60] ss:$8 sps:$4 sm:$0xff]  }
  0x77   : > { %540 = vmatpush1.bf16.msra.mxu1 %v908_v4  ;;  %581 = vmatpush1.bf16.msra.mxu0 %v949_v15  ;;  %v924_v18 = vld [vmem:[%s1278_s30 + $0x74] ss:$8 sps:$4 sm:$0xff]   ;;  %v955_v19 = vld [vmem:[%s1278_s30 + $0x110] ss:$8 sps:$4 sm:$0xff]   ;;  %v298_v22 = vld [vmem:[#allocation2 + $0x10] sm:$0xff]  ;;  %vm533_vm0 = vcmask 261120  }
  0x78   : > { %541 = vmatprep.subr.bf16.mxu1 %v909_v5  ;;  %582 = vmatprep.subr.bf16.mxu0 %v951_v16  ;;  %v297_v20 = vld [vmem:[#allocation2 + $0x8] sm:$0xff]  ;;  %v300_v21 = vld [vmem:[#allocation2 + $0x20] sm:$0xff]  ;;  %v927_v27 = vld [vmem:[%s1278_s30 + $0x84] ss:$8 sps:$4 sm:$0xff]   ;;  %s1321_s18 = sshll.u32 %s1085_s15, 1  ;;  %v344_v51 = vshrl.u32 %v343_v50, 7 }
  0x79   : > { %v303_v23 = vpack.c.bf16 %v300_v21, %v297_v20  ;;  %v301_v24 = vld [vmem:[#allocation2 + $0x28] sm:$0xff]  ;;  %v929_v28 = vld [vmem:[%s1278_s30 + $0x80] ss:$8 sps:$4 sm:$0xff]   ;;  %v933_v31 = vld [vmem:[%s1278_s30 + $0xa4] ss:$8 sps:$4 sm:$0xff]   ;;  %p279_p8 = scmp.lt.s32.totalorder %s1321_s18, 2 }
  0x7a   : > { %v304_v25 = vpack.c.bf16 %v301_v24, %v298_v22  ;;  %v926_v26 = vld [vmem:[%s1278_s30 + $0x70] ss:$8 sps:$4 sm:$0xff]   ;;  %v930_v29 = vld [vmem:[%s1278_s30 + $0x94] ss:$8 sps:$4 sm:$0xff]   ;;  %v935_v32 = vld [vmem:[%s1278_s30 + $0xa0] ss:$8 sps:$4 sm:$0xff]  }
  0x7b   : > { %542 = vmatpush1.bf16.msra.mxu1 %v911_v6  ;;  %583 = vmatpush1.bf16.msra.mxu0 %v955_v19  ;;  %v932_v30 = vld [vmem:[%s1278_s30 + $0x90] ss:$8 sps:$4 sm:$0xff]   ;;  %v936_v33 = vld [vmem:[%s1278_s30 + $0xb4] ss:$8 sps:$4 sm:$0xff]   ;;  %v939_v35 = vld [vmem:[%s1278_s30 + $0xc4] ss:$8 sps:$4 sm:$0xff]  }
  0x7c   : > { %543 = vmatprep.subr.bf16.mxu1 %v912_v7  ;;  %569 = vmatprep.mubr.bf16.mxu1 %v303_v23  ;;  %v938_v34 = vld [vmem:[%s1278_s30 + $0xb0] ss:$8 sps:$4 sm:$0xff]   ;;  %v941_v36 = vld [vmem:[%s1278_s30 + $0xc0] ss:$8 sps:$4 sm:$0xff]   ;;  %v942_v37 = vld [vmem:[%s1278_s30 + $0xd4] ss:$8 sps:$4 sm:$0xff]  }
  0x7d   : > { %v944_v38 = vld [vmem:[%s1278_s30 + $0xd0] ss:$8 sps:$4 sm:$0xff]   ;;  %v947_v39 = vld [vmem:[%s1278_s30 + $0xe4] ss:$8 sps:$4 sm:$0xff]   ;;  %v950_v40 = vld [vmem:[%s1278_s30 + $0xe0] ss:$8 sps:$4 sm:$0xff]  }
  0x7e   : > { %815 = vmatmul.mubr.msk.bf16.vlgmr.msra.gmra.mrb[0].mxu0 %vm533_vm0, %v304_v25  ;;  %v953_v41 = vld [vmem:[%s1278_s30 + $0xf4] ss:$8 sps:$4 sm:$0xff]   ;;  %v956_v42 = vld [vmem:[%s1278_s30 + $0xf0] ss:$8 sps:$4 sm:$0xff]   ;;  %v299_v44 = vld [vmem:[#allocation2 + $0x18] sm:$0xff]  ;;  %s280_s24 = scalar_select %p279_p8, %s1321_s18, 2 }
  0x7f   : > { %544 = vmatpush1.bf16.msra.mxu1 %v914_v8  ;;  %v296_v43 = vld [vmem:[#allocation2] sm:$0xff]  ;;  %v345_v52 = vsub.s32 0, %v344_v51  ;;  %v349_v54 = vsub.s32 1, %v344_v51  ;;  %s777_s29 = sshll.u32 %s1274_s19, 5  ;;  %s632_s11 = scalar_lea.sflag [#allocation4], %s1274_s19 }
  0x80   : > { %545 = vmatprep.subr.bf16.mxu1 %v915_v9  ;;  %v302_v45 = vpack.c.bf16 %v299_v44, %v296_v43  ;;  %s281_s23 = scalar_lea.vmem %s1404_s2, %s280_s24  ;;  %s264_s4 = scalar_lea.vmem [#allocation7], %s777_s29 }
  0x81   : > { %v341_v53 = vld [vmem:[%s281_s23] sm:$0x3]  ;;  %p1415_p11 = scmp.ne.s32.totalorder %s1410_s25, 0 }
  0x82   : > { %v346_v55 = vrot.slane %v341_v53, %v345_v52  ;;  %v350_v56 = vrot.slane %v341_v53, %v349_v54  ;;  %s643_s21 = ssub.s32 (%p1415_p11), 3, %s1321_s18 }
  0x83   : > { %546 = vmatpush1.bf16.msra.mxu1 %v917_v10  ;;  %p644_p0 = scmp.lt.s32.totalorder (%p1415_p11), %s643_s21, 2 }
  0x84   : > { %547 = vmatprep.subr.bf16.mxu1 %v918_v11 }
  0x87   : > { %548 = vmatpush1.bf16.msra.mxu1 %v920_v12 }
  0x88   : > { %549 = vmatprep.subr.bf16.mxu1 %v921_v14 }
  0x8b   : > { %550 = vmatpush1.bf16.msra.mxu1 %v923_v17 }
  0x8c   : > { %551 = vmatprep.subr.bf16.mxu1 %v924_v18 }
  0x8f   : > { %552 = vmatpush1.bf16.msra.mxu1 %v926_v26 }
  0x90   : > { %553 = vmatprep.subr.bf16.mxu1 %v927_v27 }
  0x93   : > { %554 = vmatpush1.bf16.msra.mxu1 %v929_v28 }
  0x94   : > { %555 = vmatprep.subr.bf16.mxu1 %v930_v29 }
  0x97   : > { %556 = vmatpush1.bf16.msra.mxu1 %v932_v30 }
  0x98   : > { %557 = vmatprep.subr.bf16.mxu1 %v933_v31 }
  0x9b   : > { %558 = vmatpush1.bf16.msra.mxu1 %v935_v32 }
  0x9c   : > { %559 = vmatprep.subr.bf16.mxu1 %v936_v33 }
  0x9f   : > { %560 = vmatpush1.bf16.msra.mxu1 %v938_v34 }
  0xa0   : > { %561 = vmatprep.subr.bf16.mxu1 %v939_v35 }
  0xa3   : > { %562 = vmatpush1.bf16.msra.mxu1 %v941_v36 }
  0xa4   : > { %563 = vmatprep.subr.bf16.mxu1 %v942_v37 }
  0xa7   : > { %564 = vmatpush1.bf16.msra.mxu1 %v944_v38 }
  0xa8   : > { %565 = vmatprep.subr.bf16.mxu1 %v947_v39 }
  0xab   : > { %566 = vmatpush1.bf16.msra.mxu1 %v950_v40 }
  0xac   : > { %567 = vmatprep.subr.bf16.mxu1 %v953_v41 }
  0xaf   : > { %568 = vmatpush1.bf16.msra.mxu1 %v956_v42 }
  0xb2   : > { %570 = vmatmul.mubr.bf16.vlgmr.msra.gmra.mrb[0].mxu1 %v302_v45 }
 0x151   : > { %v614_v46 = vpop.f32.mrb[0].mxu0 }
 0x152   : > { %v616_v47 = vpop.f32.mrb[1].mxu0 }
 0x153   : > { %v618_v48 = vpop.f32.mrb[2].mxu0 }
 0x154   : > { %v620_v49 = vpop.f32.mrb[3].mxu0 }
 0x185   : > { %v571_v57 = vpop.f32.mrb[0].mxu1 }
 0x186   : > { %v572_v58 = vadd.f32 %v571_v57, %v346_v55  ;;  %v573_v59 = vpop.f32.mrb[1].mxu1 }
 0x187   : > { %v574_v60 = vadd.f32 %v573_v59, %v350_v56  ;;  %v575_v61 = vpop.f32.mrb[2].mxu1 }
 0x188   : > { %v615_v62 = vadd.f32 %v614_v46, %v572_v58  ;;  %v576_v63 = vadd.f32 %v575_v61, %v346_v55  ;;  %v577_v0 = vpop.f32.mrb[3].mxu1 }
 0x189   : > { %v617_v1 = vadd.f32 %v616_v47, %v574_v60  ;;  %v578_v2 = vadd.f32 %v577_v0, %v350_v56  ;;  %638 = sbr.rel (!%p1415_p11) target bundleno = 429 (0x1ad), region = 44 }
 0x18a   : > { %v623_v3 = vmax.f32 %v615_v62, 0.0  ;;  %v619_v4 = vadd.f32 %v618_v48, %v576_v63 }
 0x18b   : > { %v624_v5 = vmax.f32 %v617_v1, 0.0  ;;  %v621_v6 = vadd.f32 %v620_v49, %v578_v2 }
 0x18c   : > { %627 = vst [vmem:[%s264_s4] sm:$0xff] %v623_v3  ;;  %v625_v7 = vmax.f32 %v619_v4, 0.0 }
 0x18d   : > { %628 = vst [vmem:[%s264_s4 + $0x8] sm:$0xff] %v624_v5  ;;  %v626_v8 = vmax.f32 %v621_v6, 0.0 }
 0x18e   : > { %629 = vst [vmem:[%s264_s4 + $0x10] sm:$0xff] %v625_v7 }
 0x18f   : > { %630 = vst [vmem:[%s264_s4 + $0x18] sm:$0xff] %v626_v8 }
 0x190   : > { %s1428_s21 = smov (!%p644_p0, %s643_s21), 2 }
 0x191   : > { %s1336_s6 = sshll.u32 %s1428_s21, 7 }
 0x192   : > { %s648_s7 = ssub.s32 512, %s1336_s6 }
 0x193   : > { %649 = vsyncadd %s632_s11, %s648_s7  ;;  %p819_p2 = scmp.ne.s32.totalorder %s1336_s6, 0  ;;  %s826_s25 = sshll.u32 %s1085_s15, 8 }
 0x194   : > { %s1346_s22 = scalar_lea.hbm %s1405_s3, %s826_s25  ;;  %s821_s8 = sshll.u32 %s1428_s21, 3 }
 0x195   : > { %s657_s30 = sshll.u32 %s264_s4, 4  ;;  %s1102_s24 = smov [#allocation7]   ;;  %s1349_s30 = int_to_ptr.vmem [resolvable:$true] %s657_s30 }
 0x196   : > { %s1007_s18 = scalar_lea.vmem %s1349_s30, %s1336_s6  ;;  %s1011_s28 = sshll.u32 %s1102_s24, 4  ;;  %s1012_s28 = int_to_ptr.vmem [resolvable:$false] %s1011_s28 }
 0x197   : > { %p1008_p4 = scmp.ne.s32.totalorder %s1349_s30, %s1007_s18  ;;  %s1013_s15 = scalar_lea.vmem %s1012_s28, 1024 }
 0x198   : > { %p1014_p6 = scmp.lt.s32.totalorder %s1349_s30, %s1012_s28  ;;  %p1015_p7 = scmp.lt.s32.totalorder %s1013_s15, %s1007_s18 }
 0x199   : > { %p1009_p10 = pnand %p1008_p4, %p819_p2 }
 0x19a   : > { %p1016_p12 = por %p1015_p7, %p1014_p6 }
 0x19b   : > { %p1010_p3 = pneg %p1009_p10 }
 0x19d   : > { %p1017_p13 = pnand %p1016_p12, %p1010_p3 }
 0x19f   : > { %1020 = shalt.err (!%p1017_p13)
}
 0x1a0   : > { %s1021_s10 = scalar_lea.hbm %s1346_s22, %s1336_s6  ;;  %s1025_s4 = scalar_lea.hbm %s1405_s3, 384 }
 0x1a1   : > { %p1022_p1 = scmp.ne.s32.totalorder %s1346_s22, %s1021_s10  ;;  %p1026_p8 = scmp.lt.u32.totalorder %s1346_s22, %s1405_s3 }
 0x1a2   : > { %p1027_p11 = scmp.lt.u32.totalorder %s1025_s4, %s1021_s10  ;;  %p1029_p4 = scmp.lt.u32.totalorder %s1021_s10, %s1346_s22 }
 0x1a3   : > { %p1023_p5 = pnand %p1022_p1, %p819_p2 }
 0x1a4   : > { %p1028_p0 = por %p1027_p11, %p1026_p8 }
 0x1a5   : > { %p1024_p9 = pneg %p1023_p5 }
 0x1a6   : > { %p1030_p10 = por %p1029_p4, %p1028_p0 }
 0x1a8   : > { %p1031_p3 = pnand %p1030_p10, %p1024_p9 }
 0x1aa   : > { %1034 = shalt.err (!%p1031_p3)
}
 0x1ab   : > { %s1103_s5 = smov 256   ;;  %s1104_s9 = smov 384  }
 0x1ac   : > { %663 = dma.vmem_to_hbm [thread:$0]  (%p819_p2), %s1349_s30, %s1336_s6, %s1346_s22, %s632_s11, %s1103_s5, %s1104_s9, %s821_s8  }
 0x1ad PF: > { %s672_s18 = sand.u32 1, %s1073_s12   ;;  %p1416_p6 = scmp.ne.s32.totalorder %s1411_s27, 0 }
 0x1ae   : > { %p1417_p7 = scmp.ge.s32.totalorder %s1093_s17, 2  ;;  %s673_s24 = scalar_lea.sflag [#allocation4], %s672_s18 }
 0x1b0   : > { %p842_p12 = pnand %p1417_p7, %p1416_p6 }
 0x1b2   : > { %1068 = dma.done.wait (!%p842_p12), %s673_s24, 512  }
 0x1b3   : > { %1070 = vsyncadd (!%p842_p12), %s673_s24, 4294966784  ;;  %s20_s17 = sadd.s32 1, %s1093_s17   ;;  %s1418_s12 = smov %s1077_s13 }
 0x1b4   : > { %p17_p13 = scmp.ge.s32.totalorder %s20_s17, 4   ;;  %s1419_s13 = smov %s1081_s14 }
 0x1b5   : > { %s1420_s14 = smov %s1187_s26  ;;  %s1421_s15 = smov %s1089_s16 }
 0x1b6   : > { %s1422_s16 = smov %s1424_s20  ;;  %19 = sbr.rel (!%p17_p13) target bundleno = 7 (0x7), region = 86 }
 0x1bd   :  { %678 = vsyncpa [#allocation3], 1 }
 0x1be   :  { %680 = vsyncpa [#allocation3 + $0x1], 1 }
 0x1bf   :  { %681 = vsyncpa [#allocation6], 1 }
 0x1c0   :  { %683 = vsyncpa [#allocation6 + $0x1], 1 }
 0x1c1   :  { %684 = vsyncpa [#allocation4], 1 }
 0x1c2   :  { %686 = vsyncpa [#allocation4 + $0x1], 1 }

</bundles_post_ra>
